<compile_context>
chip_gen: v7x
topology: tpu7x:2x2x1
jax: 0.10.0
libtpu: 0.0.40
codegen_flags: <defaults>
</compile_context>

<pallas_src>
import math
import functools

import jax
import jax.numpy as jnp
from jax import lax
from jax.experimental import pallas as pl
from jax.experimental.pallas import tpu as pltpu

_NEG_2LOG1E4 = -2.0 * math.log(10000.0)


# ---------------------------------------------------------------------------
# Kernels
# ---------------------------------------------------------------------------
def _pe_slab_kernel(scale_ref, freq_ref, phase_ref, pos_ref, x_ref, o_ref):
    """x tile is (tr, D); pos is (tr, 1) f32; freq/phase are (1, D) f32."""
    s = scale_ref[0]
    # (tr,1) * (1,D) + (1,D) -> (tr,D); exactly one EUP op (sin) per element.
    angle = pos_ref[...] * freq_ref[...] + phase_ref[...]
    pe = jnp.sin(angle)
    o_ref[...] = (x_ref[...].astype(jnp.float32) + s * pe).astype(o_ref.dtype)
    # TODO(synk): nn.Dropout(p=0.1) is training-only; treated as eval-mode identity.


def _pe_packed_kernel(scale_ref, freq_ref, phase_ref, x_ref, o_ref, *, shift):
    """Lane-dense path for D < 128: x tile is (tr, 128) over the flattened
    (S*B*D,) element stream.  pos = flat_index >> shift (shift = log2(B*D)),
    freq/phase are pre-tiled to (1, 128) in the wrapper."""
    tr, lanes = x_ref.shape
    s = scale_ref[0]
    row0 = pl.program_id(0) * tr
    sub = lax.broadcasted_iota(jnp.int32, (tr, lanes), 0)
    lane = lax.broadcasted_iota(jnp.int32, (tr, lanes), 1)
    elem = (row0 + sub) * lanes + lane            # flat element index
    pos = (elem >> shift).astype(jnp.float32)     # == elem // (B*D), B*D pow2
    angle = pos * freq_ref[...] + phase_ref[...]
    pe = jnp.sin(angle)
    o_ref[...] = (x_ref[...].astype(jnp.float32) + s * pe).astype(o_ref.dtype)


# ---------------------------------------------------------------------------
# Wrapper
# ---------------------------------------------------------------------------
def _row_tile(n_rows: int, row_bytes: int, *, min_steps: int = 8,
              target_bytes: int = 4 << 20) -> int:
    """~4 MiB row tiles, multiple of 16, but keep >= min_steps grid steps."""
    if n_rows <= 16:
        return n_rows                              # block == full dim
    tr = max(16, min(n_rows, target_bytes // max(1, row_bytes)))
    cap = n_rows // min_steps                      # keep both v7x TCs busy
    if cap >= 16:
        tr = min(tr, cap)
    tr = max(16, (tr // 16) * 16)
    return min(tr, n_rows)


def positional_encoding(x: jnp.ndarray, scale: jnp.ndarray, *,
                        max_len: int = 5000) -> jnp.ndarray:
    """x: (S, B, D); scale: (1,) f32.  Returns x + scale * pe[:S] (eval mode)."""
    S, B, D = x.shape
    if S > max_len:
        raise ValueError(f"seq_len {S} exceeds max_len {max_len}")

    # Lane-only sinusoid parameters, computed once on XLA (D floats):
    #   freq[d]  = 10000^(-2*(d//2)/D)
    #   phase[d] = 0 (even d, sin) or pi/2 (odd d, cos via phase shift)
    d_idx = jnp.arange(D, dtype=jnp.int32)
    freq = jnp.exp((d_idx // 2).astype(jnp.float32) * (_NEG_2LOG1E4 / D))
    phase = jnp.where(d_idx % 2 == 0, 0.0, math.pi / 2).astype(jnp.float32)

    vmem_cap = 32 * 1024 * 1024
    bd = B * D
    packed = (D < 128) and (128 % D == 0) and ((bd & (bd - 1)) == 0)

    if packed:
        # ---- lane-dense path for small D: reshape to (rows, 128) ----------
        L = 128
        freq_l = jnp.tile(freq, L // D)[None, :]       # (1, 128)
        phase_l = jnp.tile(phase, L // D)[None, :]
        total = S * B * D
        flat = x.reshape(-1)                           # free, contiguous
        pad = (-total) % L
        if pad:
            flat = jnp.pad(flat, (0, pad))
        rows = (total + pad) // L
        x2 = flat.reshape(rows, L)
        shift = bd.bit_length() - 1                    # log2(B*D)
        tr = _row_tile(rows, L * x.dtype.itemsize)

        out2 = pl.pallas_call(
            functools.partial(_pe_packed_kernel, shift=shift),
            out_shape=jax.ShapeDtypeStruct((rows, L), x.dtype),
            grid_spec=pltpu.PrefetchScalarGridSpec(
                num_scalar_prefetch=0,
                grid=(pl.cdiv(rows, tr),),
                in_specs=[
                    pl.BlockSpec(memory_space=pltpu.SMEM),        # scale (1,)
                    pl.BlockSpec((1, L), lambda i: (0, 0)),       # freq
                    pl.BlockSpec((1, L), lambda i: (0, 0)),       # phase
                    pl.BlockSpec((tr, L), lambda i: (i, 0)),      # x tile
                ],
                out_specs=pl.BlockSpec((tr, L), lambda i: (i, 0)),
            ),
            compiler_params=pltpu.CompilerParams(
                dimension_semantics=("parallel",),
                vmem_limit_bytes=vmem_cap,
            ),
        )(scale, freq_l, phase_l, x2)

        out_flat = out2.reshape(-1)
        if pad:
            out_flat = out_flat[:total]
        return out_flat.reshape(S, B, D)

    # ---- slab path: (S*B, D) rows, lane-dense whenever D >= 128 -----------
    # TODO(synk): for D < 128 with non-pow2 B*D this path has masked lane
    # stores; acceptable fallback for unusual shapes.
    N = S * B
    x2 = x.reshape(N, D)
    # Per-row sequence position (tiny (N,1) f32 side stream; avoids vector
    # integer division in the kernel).
    pos = (jnp.arange(N, dtype=jnp.int32) // B).astype(jnp.float32)[:, None]
    tr = _row_tile(N, D * x.dtype.itemsize)

    out2 = pl.pallas_call(
        _pe_slab_kernel,
        out_shape=jax.ShapeDtypeStruct((N, D), x.dtype),
        grid_spec=pltpu.PrefetchScalarGridSpec(
            num_scalar_prefetch=0,
            grid=(pl.cdiv(N, tr),),
            in_specs=[
                pl.BlockSpec(memory_space=pltpu.SMEM),            # scale (1,)
                pl.BlockSpec((1, D), lambda i: (0, 0)),           # freq
                pl.BlockSpec((1, D), lambda i: (0, 0)),           # phase
                pl.BlockSpec((tr, 1), lambda i: (i, 0)),          # positions
                pl.BlockSpec((tr, D), lambda i: (i, 0)),          # x tile
            ],
            out_specs=pl.BlockSpec((tr, D), lambda i: (i, 0)),
        ),
        compiler_params=pltpu.CompilerParams(
            dimension_semantics=("parallel",),
            vmem_limit_bytes=vmem_cap,
        ),
    )(scale, freq[None, :], phase[None, :], pos, x2)
    return out2.reshape(S, B, D)


# ---------------------------------------------------------------------------
# Pure-JAX reference (mirrors the PyTorch buffer construction)
# ---------------------------------------------------------------------------
def make_pe_table(max_len: int, d_model: int) -> jnp.ndarray:
    """Reference sinusoidal table, shape (max_len, 1, d_model), f32."""
    position = jnp.arange(max_len, dtype=jnp.float32)[:, None]
    div_term = jnp.exp(jnp.arange(0, d_model, 2, dtype=jnp.float32)
                       * (-math.log(10000.0) / d_model))
    pe = jnp.zeros((max_len, d_model), dtype=jnp.float32)
    pe = pe.at[:, 0::2].set(jnp.sin(position * div_term))
    pe = pe.at[:, 1::2].set(jnp.cos(position * div_term))
    return pe[:, None, :]


if __name__ == "__main__":
    key = jax.random.PRNGKey(0)
    k1, k2 = jax.random.split(key)
    scale = jnp.full((1,), 1.5, dtype=jnp.float32)   # nn.Parameter(torch.ones(1)); 1.5 to exercise scaling
    max_len = 64

    # Case 1: small demo width (D=32 < 128) -> lane-packed path.
    S, B, D = 8, 2, 32
    x = jax.random.normal(k1, (S, B, D), dtype=jnp.float32)
    out = positional_encoding(x, scale, max_len=max_len)
    jax.block_until_ready(out)
    ref = x + scale[0] * make_pe_table(max_len, D)[:S]
    assert out.shape == (S, B, D)
    assert jnp.allclose(out, ref, atol=1e-4, rtol=1e-4), "packed-path mismatch"

    # Case 2: lane-dense transformer width (D=128) -> slab path.
    S2, B2, D2 = 8, 2, 128
    x2 = jax.random.normal(k2, (S2, B2, D2), dtype=jnp.float32)
    out2 = positional_encoding(x2, scale, max_len=max_len)
    jax.block_until_ready(out2)
    ref2 = x2 + scale[0] * make_pe_table(max_len, D2)[:S2]
    assert jnp.allclose(out2, ref2, atol=1e-4, rtol=1e-4), "slab-path mismatch"

    print("KERNEL_OK")
</pallas_src>

<mosaic_0001>
module attributes {stable_mosaic.version = 11 : i64} {
  func.func @_pe_packed_kernel(%arg0: i32, %arg1: memref<1xf32, #tpu.memory_space<smem>>, %arg2: memref<1x128xf32, #tpu.memory_space<vmem>>, %arg3: memref<1x128xf32, #tpu.memory_space<vmem>>, %arg4: memref<4x128xf32, #tpu.memory_space<vmem>>, %arg5: memref<4x128xf32, #tpu.memory_space<vmem>>) attributes {dimension_semantics = [#tpu.dimension_semantics<parallel>], iteration_bounds = array<i64: 1>, scalar_prefetch = 0 : i64, scratch_operands = 0 : i64, tpu.core_type = #tpu.core_type<tc>, window_params = [{transform_indices = @transform_0, window_bounds = array<i64: 1>}, {pipeline_mode = #tpu.pipeline_mode<synchronous>, transform_indices = @transform_1, window_bounds = array<i64: 1, 128>}, {pipeline_mode = #tpu.pipeline_mode<synchronous>, transform_indices = @transform_2, window_bounds = array<i64: 1, 128>}, {transform_indices = @transform_3, window_bounds = array<i64: 4, 128>}, {transform_indices = @transform_4, window_bounds = array<i64: 4, 128>}]} {
    %c0 = arith.constant 0 : index
    %0 = memref.load %arg1[%c0] : memref<1xf32, #tpu.memory_space<smem>>
    %c4_i32 = arith.constant 4 : i32
    %1 = arith.muli %arg0, %c4_i32 : i32
    %2 = tpu.iota {dimensions = array<i32: 0>} : vector<4x128xi32>
    %3 = tpu.iota {dimensions = array<i32: 1>} : vector<4x128xi32>
    %4 = vector.broadcast %1 : i32 to vector<4x128xi32>
    %5 = arith.addi %4, %2 : vector<4x128xi32>
    %c128_i32 = arith.constant 128 : i32
    %6 = vector.broadcast %c128_i32 : i32 to vector<4x128xi32>
    %7 = arith.muli %5, %6 : vector<4x128xi32>
    %8 = arith.addi %7, %3 : vector<4x128xi32>
    %c6_i32 = arith.constant 6 : i32
    %9 = vector.broadcast %c6_i32 : i32 to vector<4x128xi32>
    %10 = arith.shrsi %8, %9 : vector<4x128xi32>
    %11 = arith.sitofp %10 : vector<4x128xi32> to vector<4x128xf32>
    %c0_0 = arith.constant 0 : index
    %c0_1 = arith.constant 0 : index
    %12 = vector.load %arg2[%c0_0, %c0_1] : memref<1x128xf32, #tpu.memory_space<vmem>>, vector<1x128xf32>
    %13 = vector.broadcast %12 : vector<1x128xf32> to vector<4x128xf32>
    %14 = arith.mulf %11, %13 : vector<4x128xf32>
    %c0_2 = arith.constant 0 : index
    %c0_3 = arith.constant 0 : index
    %15 = vector.load %arg3[%c0_2, %c0_3] : memref<1x128xf32, #tpu.memory_space<vmem>>, vector<1x128xf32>
    %16 = vector.broadcast %15 : vector<1x128xf32> to vector<4x128xf32>
    %17 = arith.addf %14, %16 : vector<4x128xf32>
    %18 = math.sin %17 : vector<4x128xf32>
    %c0_4 = arith.constant 0 : index
    %c0_5 = arith.constant 0 : index
    %19 = vector.load %arg4[%c0_4, %c0_5] : memref<4x128xf32, #tpu.memory_space<vmem>>, vector<4x128xf32>
    %20 = vector.broadcast %0 : f32 to vector<4x128xf32>
    %21 = arith.mulf %20, %18 : vector<4x128xf32>
    %22 = arith.addf %19, %21 : vector<4x128xf32>
    %c0_6 = arith.constant 0 : index
    %c0_7 = arith.constant 0 : index
    %23 = vector.load %arg5[%c0_6, %c0_7] : memref<4x128xf32, #tpu.memory_space<vmem>>, vector<4x128xf32>
    tpu.vector_store %arg5[%c0_6, %c0_7], %22 {strides = array<i32>} : memref<4x128xf32, #tpu.memory_space<vmem>>, vector<4x128xf32>,
    return
  }
  func.func @transform_0(%arg0: i32) -> i32 {
    %c0_i32 = arith.constant 0 : i32
    %c0_i32_0 = arith.constant 0 : i32
    return %c0_i32 : i32
  }
  func.func @transform_1(%arg0: i32) -> (i32, i32) {
    %c0_i32 = arith.constant 0 : i32
    %c0_i32_0 = arith.constant 0 : i32
    %c0_i32_1 = arith.constant 0 : i32
    return %c0_i32, %c0_i32_0 : i32, i32
  }
  func.func @transform_2(%arg0: i32) -> (i32, i32) {
    %c0_i32 = arith.constant 0 : i32
    %c0_i32_0 = arith.constant 0 : i32
    %c0_i32_1 = arith.constant 0 : i32
    return %c0_i32, %c0_i32_0 : i32, i32
  }
  func.func @transform_3(%arg0: i32) -> (i32, i32) {
    %c0_i32 = arith.constant 0 : i32
    %c0_i32_0 = arith.constant 0 : i32
    return %arg0, %c0_i32 : i32, i32
  }
  func.func @transform_4(%arg0: i32) -> (i32, i32) {
    %c0_i32 = arith.constant 0 : i32
    %c0_i32_0 = arith.constant 0 : i32
    return %arg0, %c0_i32 : i32, i32
  }
}

</mosaic_0001>

<bundles_post_ra>
// kernel: tpu_custom_call.1
= control target key start
LH: loop header
LB: loop body
LE: loop exit
PB: predicated region body
PF: predicated region fallthrough
CT: control target
= control target key end

     0   :  { %v21_v0 = vlaneseq  ;;  %s292_s0 = inlined_call_operand.<no memory space> [shape: f32[1], index: 0, kind: input, shape index: {}]   ;;  %s293_s1 = inlined_call_operand.vmem [shape: f32[1,128], index: 1, kind: input, shape index: {}]   ;;  %s294_s2 = inlined_call_operand.vmem [shape: f32[1,128], index: 2, kind: input, shape index: {}]   ;;  %s295_s3 = inlined_call_operand.vmem [shape: f32[4,128], index: 3, kind: input, shape index: {}]   ;;  %s296_s4 = inlined_call_operand.hbm [shape: f32[4,128], index: 4, kind: output, shape index: {}]  }
   0x2   :  { %v22_v1 = vshrl.u32 %v21_v0, 7  ;;  %v24_v2 = vand.u32 127, %v21_v0 }
   0x3   :  { %10 = vsyncpa [#allocation4], 0  ;;  %v170_v6 = vld [vmem:[%s293_s1] ss:$0 sm:$0xff]  ;;  %v215_v22 = vmov 683565275  }
   0x4   :  { %v27_v3 = vmul.u32 128, %v22_v1  ;;  %v171_v8 = vld [vmem:[%s294_s2] ss:$0 sm:$0xff]  ;;  %v216_v24 = vmov 2475754826   ;;  %s221_s21 = smov [#allocation3]  }
   0x5   :  { %v217_v26 = vmov 2131351028   ;;  %v218_v28 = vmov 2102212464   ;;  %v219_v30 = vmov 920167782  }
   0x6   :  { %v28_v4 = vadd.s32 %v27_v3, %v24_v2  ;;  %v220_v37 = vmov 1326507024   ;;  %s162_s22 = sshll.u32 %s221_s21, 4  ;;  %s163_s22 = int_to_ptr.vmem [resolvable:$true] %s162_s22 }
   0x7   :  { %s191_s23 = scalar_lea.vmem %s163_s22, 64  ;;  %p196_p1 = scmp.lt.s32.totalorder %s163_s22, %s163_s22 }
   0x8   :  { %v29_v5 = vshra.s32 %v28_v4, 6  ;;  %p192_p0 = scmp.ne.s32.totalorder %s163_s22, %s191_s23  ;;  %p197_p2 = scmp.lt.s32.totalorder %s191_s23, %s191_s23 }
   0xa   :  { %v30_v7 = vcvt.s32.f32 %v29_v5  ;;  %p198_p3 = por %p197_p2, %p196_p1 }
   0xc   :  { %v38_v9 = vmul.f32 %v170_v6, %v30_v7  ;;  %p199_p4 = pnand %p198_p3, %p192_p0 }
   0xe   :  { %v253_v10 = vadd.f32 %v171_v8, %v38_v9 }
  0x10   :  { %v50_v11 = vand.u32 2139095040, %v253_v10  ;;  %v47_v13 = vand.u32 2147483647, %v253_v10  ;;  %vm49_vm7 = vcmp.lt.s32.totalorder %v253_v10, 0  ;;  %vm139_vm12 = vweird.f32 %v253_v10 }
  0x12   :  { %v51_v12 = vshrl.u32 %v50_v11, 23  ;;  %v54_v16 = vand.u32 8388607, %v47_v13  ;;  %vm48_vm8 = vcmp.le.f32.partialorder %v47_v13, 0.7853982 }
  0x14   :  { %v172_v14 = vadd.s32 4294967169, %v51_v12  ;;  %v55_v19 = vor.u32 8388608, %v54_v16 }
  0x16   :  { %v57_v15 = vadd.s32 1, %v172_v14  ;;  %v95_v39 = vshll.u32 %v55_v19, 8 }
  0x18   :  { %vm58_vm0 = vcmp.gt.s32.totalorder %v57_v15, 0 }
  0x19   :  { %v59_v17 = vsel %vm58_vm0, %v57_v15, 0 }
  0x1a   :  { %v61_v18 = vand.u32 31, %v59_v17  ;;  %v60_v20 = vshrl.u32 %v59_v17, 5 }
  0x1c   :  { %v62_v21 = vsub.s32 32, %v61_v18  ;;  %v64_v23 = vshll.u32 %v215_v22, %v61_v18  ;;  %v67_v25 = vshll.u32 %v216_v24, %v61_v18  ;;  %v70_v27 = vshll.u32 %v217_v26, %v61_v18 }
  0x1d   :  { %v73_v29 = vshll.u32 %v218_v28, %v61_v18  ;;  %v76_v31 = vshll.u32 %v219_v30, %v61_v18  ;;  %vm79_vm1 = vcmp.lt.s32.totalorder %v60_v20, 1  ;;  %vm82_vm2 = vcmp.lt.s32.totalorder %v60_v20, 4 }
  0x1e   :  { %v63_v32 = vshrl.u32 %v215_v22, %v62_v21  ;;  %v65_v33 = vshrl.u32 %v216_v24, %v62_v21  ;;  %v68_v34 = vshrl.u32 %v217_v26, %v62_v21  ;;  %v71_v35 = vshrl.u32 %v218_v28, %v62_v21 }
  0x1f   :  { %v74_v36 = vshrl.u32 %v219_v30, %v62_v21  ;;  %v77_v38 = vshrl.u32 %v220_v37, %v62_v21  ;;  %vm80_vm3 = vcmp.lt.s32.totalorder %v60_v20, 2  ;;  %vm81_vm4 = vcmp.lt.s32.totalorder %v60_v20, 3 }
  0x20   :  { %v66_v40 = vor.u32 %v65_v33, %v64_v23  ;;  %v69_v41 = vor.u32 %v68_v34, %v67_v25  ;;  %v72_v42 = vor.u32 %v71_v35, %v70_v27  ;;  %v152_v37 = vstv %s292_s0 }
  0x21   :  { %v75_v43 = vor.u32 %v74_v36, %v73_v29  ;;  %v78_v44 = vor.u32 %v77_v38, %v76_v31 }
  0x22   :  { %v83_v45 = vsel %vm79_vm1, %v63_v32, %v66_v40  ;;  %v84_v46 = vsel %vm82_vm2, %v72_v42, 2102212464  ;;  %v87_v47 = vsel %vm79_vm1, %v66_v40, %v69_v41  ;;  %v91_v48 = vsel %vm79_vm1, %v69_v41, %v72_v42  ;;  %v151_v40 = vld [vmem:[%s295_s3] sm:$0xf] }
  0x23   :  { %v85_v49 = vsel %vm81_vm4, %v69_v41, %v84_v46  ;;  %v88_v50 = vsel %vm82_vm2, %v75_v43, 920167782  ;;  %v92_v51 = vsel %vm82_vm2, %v78_v44, 1326507024 }
  0x24   :  { %v89_v52 = vsel %vm81_vm4, %v72_v42, %v88_v50  ;;  %v93_v53 = vsel %vm81_vm4, %v75_v43, %v92_v51  ;;  %v86_v54 = vsel %vm80_vm3, %v83_v45, %v85_v49 }
  0x25   :  { %v90_v55 = vsel %vm80_vm3, %v87_v47, %v89_v52  ;;  %v94_v56 = vsel %vm80_vm3, %v91_v48, %v93_v53  ;;  %v102_v61 = vmul.u32 %v95_v39, %v86_v54 }
  0x26   :  { %v259_v57 = vmul.u32.u64.low %v95_v39, %v94_v56  ;;  %v260_v58 = vmul.u32.u64.high %v95_v39, %v94_v56, %v259_v57  ;;  %v262_v59 = vmul.u32.u64.low %v95_v39, %v90_v55  ;;  %v263_v60 = vmul.u32.u64.high %v95_v39, %v90_v55, %v262_v59 }
  0x28   :  { %vm104_vm5 = vc.u32 %v260_v58, %v262_v59  ;;  %v105_v62 = vadd.s32 1, %v263_v60  ;;  %v103_v9 = vadd.s32 %v262_v59, %v260_v58 }
  0x2a   :  { %v106_v63 = vsel %vm104_vm5, %v105_v62, %v263_v60 }
  0x2b   :  { %v107_v0 = vadd.s32 %v106_v63, %v102_v61 }
  0x2d   :  { %v108_v1 = vadd.s32 536870912, %v107_v0 }
  0x2f   :  { %v109_v2 = vshrl.u32 %v108_v1, 30 }
  0x31   :  { %v110_v3 = vshll.u32 %v109_v2, 30  ;;  %v133_v23 = vsub.s32 4, %v109_v2 }
  0x33   :  { %v111_v4 = vsub.s32 %v107_v0, %v110_v3  ;;  %v134_v26 = vsel %vm49_vm7, %v133_v23, %v109_v2 }
  0x34   :  { %v136_v29 = vsel %vm48_vm8, 0, %v134_v26 }
  0x35   :  { %v113_v5 = vsub.s32 0, %v111_v4  ;;  %v140_v30 = vadd.s32 3, %v136_v29 }
  0x37   :  { %v173_v6 = vmin.u32 %v113_v5, %v111_v4  ;;  %v141_v31 = vand.u32 3, %v140_v30 }
  0x39   :  { %v115_v7 = vclz %v173_v6  ;;  %vm146_vm9 = vcmp.eq.s32.totalorder %v141_v31, 2  ;;  %vm143_vm10 = vcmp.eq.s32.totalorder %v141_v31, 0  ;;  %vm142_vm11 = vcmp.lt.s32.totalorder %v141_v31, 2 }
  0x3b   :  { %v174_v8 = vadd.s32 4294967294, %v115_v7 }
  0x3d   :  { %vm175_vm6 = vcmp.lt.s32.totalorder %v174_v8, 0 }
  0x3e   :  { %v118_v11 = vsel %vm175_vm6, 0, %v174_v8 }
  0x3f   :  { %v119_v12 = vsub.s32 32, %v118_v11  ;;  %v120_v14 = vshll.u32 %v111_v4, %v118_v11  ;;  %v123_v15 = vsub.s32 4294967266, %v118_v11 }
  0x41   :  { %v121_v16 = vshrl.u32 %v103_v9, %v119_v12  ;;  %v124_v17 = vadd.s32 127, %v123_v15 }
  0x43   :  { %v122_v18 = vor.u32 %v121_v16, %v120_v14  ;;  %v125_v19 = vshll.u32 %v124_v17, 23 }
  0x45   :  { %v126_v20 = vor.u32 4788187, %v125_v19  ;;  %v129_v21 = vcvt.s32.f32 %v122_v18 }
  0x47   :  { %v127_v22 = vand.u32 2147483647, %v126_v20 }
  0x49   :  { %v130_v24 = vmul.f32 %v129_v21, %v127_v22 }
  0x4b   :  { %v131_v25 = vxor.u32 2147483648, %v130_v24 }
  0x4d   :  { %v132_v27 = vsel %vm49_vm7, %v131_v25, %v130_v24 }
  0x4e   :  { %v135_v28 = vsel %vm48_vm8, %v253_v10, %v132_v27 }
  0x4f   :  { %187 = vcosq.f32 %v135_v28 }
  0x50   :  { %189 = vsinq.f32 %v135_v28 }
  0x59   :  { %v188_v32 = vpop.eup %187 }
  0x5a   :  { %v190_v33 = vpop.eup %189  ;;  %v147_v34 = vxor.u32 2147483648, %v188_v32 }
  0x5b   :  { %v144_v35 = vxor.u32 2147483648, %v190_v33 }
  0x5c   :  { %v148_v13 = vsel %vm146_vm9, %v147_v34, %v190_v33 }
  0x5d   :  { %v145_v36 = vsel %vm143_vm10, %v188_v32, %v144_v35 }
  0x5e   :  { %v149_v38 = vsel %vm142_vm11, %v145_v36, %v148_v13 }
  0x5f   :  { %v150_v39 = vsel %vm139_vm12, nan, %v149_v38 }
  0x60   :  { %v153_v41 = vmul.f32 %v152_v37, %v150_v39 }
  0x62   :  { %v154_v42 = vadd.f32 %v153_v41, %v151_v40 }
  0x64   :  { %155 = vst [vmem:[#allocation3] sm:$0xf] %v154_v42 }
  0x65   :  { %202 = shalt.err (!%p199_p4)
}
  0x66   :  { %s203_s25 = scalar_lea.hbm %s296_s4, 64 }
  0x67   :  { %p204_p5 = scmp.ne.s32.totalorder %s296_s4, %s203_s25  ;;  %p207_p6 = scmp.lt.u32.totalorder %s203_s25, %s296_s4 }
  0x69   :  { %p209_p7 = pnand %p207_p6, %p204_p5 }
  0x6b   :  { %212 = shalt.err (!%p209_p7)
}
  0x6c   :  { %165 = dma.vmem_to_hbm [thread:$0]  %s163_s22, 64, %s296_s4, [#allocation4]  }
  0x6d   :  { %213 = dma.done.wait [#allocation4], 64  }
  0x6e   :  { %214 = vsyncadd [#allocation4], 4294967232 }
  0x6f   :  { %169 = vsyncpa [#allocation4], 1 }

</bundles_post_ra>
